<compile_context>
chip_gen: v7x
topology: tpu7x:2x2x1
jax: 0.10.0
libtpu: 0.0.40
codegen_flags: <defaults>
</compile_context>

<pallas_src>
import jax
import jax.numpy as jnp
from jax import lax
from jax.experimental import pallas as pl
from jax.experimental.pallas import tpu as pltpu


def _round_up(a, b):
    return ((a + b - 1) // b) * b


def _l2_weights_kernel(l1_ref, map_ref, l2_ref):
    # Row softmax over V1 in f32 (v5e has no bf16 VPU/EUP), then the small
    # [V2, V1] @ [V1, D] projection.  This kernel runs once per call, so the
    # exact reciprocal is effectively free.
    m = map_ref[...].astype(jnp.float32)
    m = m - jnp.max(m, axis=1, keepdims=True)
    e = jnp.exp(m)
    sm = e * pl.reciprocal(jnp.sum(e, axis=1, keepdims=True), approx=False)
    l2 = jnp.dot(sm, l1_ref[...].astype(jnp.float32),
                 preferred_element_type=jnp.float32)
    l2_ref[...] = l2.astype(l2_ref.dtype)


def _apply_kernel(x_ref, l2_ref, o_ref):
    # out_tile = x_tile @ l2.T, contracted on D without materializing l2.T.
    # Operands stay in the input dtype; accumulation is f32 on the MXU.
    out = lax.dot_general(
        x_ref[...], l2_ref[...],
        dimension_numbers=(((1,), (1,)), ((), ())),
        preferred_element_type=jnp.float32)
    o_ref[...] = out.astype(o_ref.dtype)


def map_linear(x, l1_weights, map_weights):
    """x: [..., D], l1_weights: [V1, D], map_weights: [V2, V1] -> [..., V2]."""
    assert x.ndim > 1, "x should be at least 2 dimensional"
    V1, D = l1_weights.shape
    V2, V1m = map_weights.shape
    assert V1m == V1
    assert x.shape[-1] == D

    lead = x.shape[:-1]
    x2d = x.reshape(-1, D)
    N = x2d.shape[0]

    itemsize = jnp.dtype(x.dtype).itemsize

    # Lane-dense output: pad V2 up to a multiple of 128 (sliced off at the end).
    V2_pad = _round_up(V2, 128)

    # Choose row-tile TN: biggest that fits a conservative VMEM budget that is
    # safe on v5e/v6e/v7x, in multiples of 8 (sublane).
    def _footprint(tn):
        # double-buffered x tile + out tile, plus the (buffered) resident l2.
        return 2 * tn * (D + V2_pad) * itemsize + 2 * V2_pad * D * itemsize

    _VMEM_BUDGET = 20 * (1 << 20)
    N8 = _round_up(N, 8)
    TN = min(512, N8)
    while TN > 8 and _footprint(TN) > _VMEM_BUDGET:
        TN = max(8, (TN // 2) // 8 * 8)
    N_pad = _round_up(N, TN)

    # Pad inputs (zeros): extra x rows / extra map rows produce rows/columns
    # that are sliced away below; they do not affect the real outputs.
    x_pad = x2d if N_pad == N else jnp.pad(x2d, ((0, N_pad - N), (0, 0)))
    map_pad = (map_weights if V2_pad == V2
               else jnp.pad(map_weights, ((0, V2_pad - V2), (0, 0))))

    # --- Kernel A: l2 = softmax(map) @ l1, computed once. -------------------
    l2 = pl.pallas_call(
        _l2_weights_kernel,
        out_shape=jax.ShapeDtypeStruct((V2_pad, D), x.dtype),
        grid=(1,),
        in_specs=[
            pl.BlockSpec((V1, D), lambda i: (0, 0)),
            pl.BlockSpec((V2_pad, V1), lambda i: (0, 0)),
        ],
        out_specs=pl.BlockSpec((V2_pad, D), lambda i: (0, 0)),
        compiler_params=pltpu.CompilerParams(
            dimension_semantics=("arbitrary",)),
    )(l1_weights, map_pad)

    # --- Kernel B: out = x @ l2.T, tiled and pipelined over N. ---------------
    out_pad = pl.pallas_call(
        _apply_kernel,
        out_shape=jax.ShapeDtypeStruct((N_pad, V2_pad), x.dtype),
        grid=(N_pad // TN,),
        in_specs=[
            pl.BlockSpec((TN, D), lambda i: (i, 0)),       # streamed x tiles
            pl.BlockSpec((V2_pad, D), lambda i: (0, 0)),   # VMEM-resident l2
        ],
        out_specs=pl.BlockSpec((TN, V2_pad), lambda i: (i, 0)),
        compiler_params=pltpu.CompilerParams(
            dimension_semantics=("parallel",),
            vmem_limit_bytes=40 * (1 << 20)),
    )(x_pad, l2)

    out2d = out_pad[:N, :V2]
    return out2d.reshape(*lead, V2)


if __name__ == "__main__":
    key = jax.random.PRNGKey(0)
    k1, k2, k3, k4 = jax.random.split(key, 4)

    # Small, deterministic shapes consistent with the module:
    #   hidden D=32, l1 vocab V1=16, mapped vocab V2=8, x = [batch=2, seq=8, D]
    D, V1, V2 = 32, 16, 8
    x = jax.random.normal(k1, (2, 8, D), dtype=jnp.float32)
    l1_weights = jax.random.normal(k2, (V1, D), dtype=jnp.float32)
    map_weights = jax.random.normal(k3, (V2, V1), dtype=jnp.float32)

    out = map_linear(x, l1_weights, map_weights)
    jax.block_until_ready(out)

    # Pure-JAX reference check.
    l2_ref = jax.nn.softmax(map_weights, axis=1) @ l1_weights
    ref = x @ l2_ref.T
    assert out.shape == ref.shape == (2, 8, V2)
    assert jnp.allclose(out, ref, atol=1e-3, rtol=1e-3)

    # Second check exercising the multi-tile grid path + N remainder padding.
    x_big = jax.random.normal(k4, (2, 300, D), dtype=jnp.float32)  # N=600 > TN
    out_big = map_linear(x_big, l1_weights, map_weights)
    jax.block_until_ready(out_big)
    ref_big = x_big @ l2_ref.T
    assert out_big.shape == ref_big.shape == (2, 300, V2)
    assert jnp.allclose(out_big, ref_big, atol=1e-3, rtol=1e-3)

    print("KERNEL_OK")
</pallas_src>

<mosaic_0001>
module attributes {stable_mosaic.version = 11 : i64} {
  func.func @_l2_weights_kernel(%arg0: i32, %arg1: memref<16x32xf32, #tpu.memory_space<vmem>>, %arg2: memref<128x16xf32, #tpu.memory_space<vmem>>, %arg3: memref<128x32xf32, #tpu.memory_space<vmem>>) attributes {dimension_semantics = [#tpu.dimension_semantics<arbitrary>], iteration_bounds = array<i64: 1>, scalar_prefetch = 0 : i64, scratch_operands = 0 : i64, tpu.core_type = #tpu.core_type<tc>, window_params = [{pipeline_mode = #tpu.pipeline_mode<synchronous>, transform_indices = @transform_0, window_bounds = array<i64: 16, 32>}, {pipeline_mode = #tpu.pipeline_mode<synchronous>, transform_indices = @transform_1, window_bounds = array<i64: 128, 16>}, {pipeline_mode = #tpu.pipeline_mode<synchronous>, transform_indices = @transform_2, window_bounds = array<i64: 128, 32>}]} {
    %c0 = arith.constant 0 : index
    %c0_0 = arith.constant 0 : index
    %0 = vector.load %arg2[%c0, %c0_0] : memref<128x16xf32, #tpu.memory_space<vmem>>, vector<128x16xf32>
    %cst = arith.constant dense<0xFF800000> : vector<128xf32>
    %1 = vector.multi_reduction <maximumf>, %0, %cst [1] : vector<128x16xf32> to vector<128xf32>
    %2 = vector.shape_cast %1 : vector<128xf32> to vector<128x1xf32>
    %3 = vector.broadcast %2 : vector<128x1xf32> to vector<128x16xf32>
    %4 = arith.subf %0, %3 : vector<128x16xf32>
    %5 = math.exp %4 : vector<128x16xf32>
    %cst_1 = arith.constant dense<0.000000e+00> : vector<128xf32>
    %6 = vector.multi_reduction <add>, %5, %cst_1 [1] : vector<128x16xf32> to vector<128xf32>
    %7 = vector.shape_cast %6 : vector<128xf32> to vector<128x1xf32>
    %8 = tpu.reciprocal %7 : vector<128x1xf32> -> vector<128x1xf32>
    %9 = vector.broadcast %8 : vector<128x1xf32> to vector<128x16xf32>
    %10 = arith.mulf %5, %9 : vector<128x16xf32>
    %c0_2 = arith.constant 0 : index
    %c0_3 = arith.constant 0 : index
    %11 = vector.load %arg1[%c0_2, %c0_3] : memref<16x32xf32, #tpu.memory_space<vmem>>, vector<16x32xf32>
    %cst_4 = arith.constant dense<0.000000e+00> : vector<128x32xf32>
    %12 = tpu.matmul %10, %11, %cst_4 {dimension_numbers = #tpu.dot_dimension_numbers<[1], [0], [0], [1], [0, 0, 1, 1], [], []>} : vector<128x16xf32>, vector<16x32xf32>, vector<128x32xf32> -> vector<128x32xf32>
    %c0_5 = arith.constant 0 : index
    %c0_6 = arith.constant 0 : index
    %13 = vector.load %arg3[%c0_5, %c0_6] : memref<128x32xf32, #tpu.memory_space<vmem>>, vector<128x32xf32>
    tpu.vector_store %arg3[%c0_5, %c0_6], %12 {strides = array<i32>} : memref<128x32xf32, #tpu.memory_space<vmem>>, vector<128x32xf32>,
    return
  }
  func.func @transform_0(%arg0: i32) -> (i32, i32) {
    %c0_i32 = arith.constant 0 : i32
    %c0_i32_0 = arith.constant 0 : i32
    %c0_i32_1 = arith.constant 0 : i32
    return %c0_i32, %c0_i32_0 : i32, i32
  }
  func.func @transform_1(%arg0: i32) -> (i32, i32) {
    %c0_i32 = arith.constant 0 : i32
    %c0_i32_0 = arith.constant 0 : i32
    %c0_i32_1 = arith.constant 0 : i32
    return %c0_i32, %c0_i32_0 : i32, i32
  }
  func.func @transform_2(%arg0: i32) -> (i32, i32) {
    %c0_i32 = arith.constant 0 : i32
    %c0_i32_0 = arith.constant 0 : i32
    %c0_i32_1 = arith.constant 0 : i32
    return %c0_i32, %c0_i32_0 : i32, i32
  }
}

</mosaic_0001>

<bundles_post_ra>
// kernel: tpu_custom_call.1
= control target key start
LH: loop header
LB: loop body
LE: loop exit
PB: predicated region body
PF: predicated region fallthrough
CT: control target
= control target key end

     0   :  { %vm27_vm0 = vcmask 130048   ;;  %vm399_vm1 = vcmask 261120   ;;  %s829_s1 = inlined_call_operand.vmem [shape: f32[128,16], index: 1, kind: input, shape index: {}]   ;;  %s830_s0 = inlined_call_operand.vmem [shape: f32[16,32], index: 0, kind: input, shape index: {}]   ;;  %s831_s2 = inlined_call_operand.vmem [shape: f32[128,32], index: 2, kind: output, shape index: {}]  }
   0x1   :  { %v11_v0 = vld [vmem:[%s829_s1] sm:$0xff]  ;;  %v12_v1 = vld [vmem:[%s829_s1 + $0x8] sm:$0xff]  ;;  %v13_v8 = vld [vmem:[%s829_s1 + $0x10] sm:$0xff] }
   0x2   :  { %v19_v2 = vld [vmem:[%s829_s1 + $0x40] sm:$0xff]  ;;  %v28_v3 = vsel %vm27_vm0, %v11_v0, -inf  ;;  %v31_v4 = vsel %vm27_vm0, %v12_v1, -inf  ;;  %v20_v5 = vld [vmem:[%s829_s1 + $0x48] sm:$0xff]  ;;  %v21_v9 = vld [vmem:[%s829_s1 + $0x50] sm:$0xff]  ;;  %v34_v10 = vsel %vm27_vm0, %v13_v8, -inf }
   0x3   :  { %29 = vmax.xlane.f32.xlu0 %v28_v3  ;;  %32 = vmax.xlane.f32.xlu1 %v31_v4  ;;  %v52_v6 = vsel %vm27_vm0, %v19_v2, -inf  ;;  %v55_v7 = vsel %vm27_vm0, %v20_v5, -inf  ;;  %v58_v11 = vsel %vm27_vm0, %v21_v9, -inf  ;;  %v14_v12 = vld [vmem:[%s829_s1 + $0x18] sm:$0xff]  ;;  %v602_v16 = vld [vmem:[%s829_s1 + $0x20] sm:$0xff]  ;;  %v616_v20 = vld [vmem:[%s829_s1 + $0x28] sm:$0xff] }
   0x4   :  { %v22_v13 = vld [vmem:[%s829_s1 + $0x58] sm:$0xff]  ;;  %v37_v14 = vsel %vm27_vm0, %v14_v12, -inf  ;;  %v607_v17 = vld [vmem:[%s829_s1 + $0x60] sm:$0xff]  ;;  %v40_v18 = vsel %vm27_vm0, %v602_v16, -inf  ;;  %v621_v21 = vld [vmem:[%s829_s1 + $0x68] sm:$0xff]  ;;  %v43_v22 = vsel %vm27_vm0, %v616_v20, -inf }
   0x5   :  { %v61_v15 = vsel %vm27_vm0, %v22_v13, -inf  ;;  %v64_v19 = vsel %vm27_vm0, %v607_v17, -inf  ;;  %v67_v23 = vsel %vm27_vm0, %v621_v21, -inf  ;;  %v630_v24 = vld [vmem:[%s829_s1 + $0x30] sm:$0xff]  ;;  %v644_v28 = vld [vmem:[%s829_s1 + $0x38] sm:$0xff] }
   0x6   :  { %v635_v25 = vld [vmem:[%s829_s1 + $0x70] sm:$0xff]  ;;  %v46_v26 = vsel %vm27_vm0, %v630_v24, -inf  ;;  %v649_v29 = vld [vmem:[%s829_s1 + $0x78] sm:$0xff]  ;;  %v49_v30 = vsel %vm27_vm0, %v644_v28, -inf }
   0x7   :  { %53 = vmax.xlane.f32.xlu0 %v52_v6  ;;  %56 = vmax.xlane.f32.xlu1 %v55_v7  ;;  %v70_v27 = vsel %vm27_vm0, %v635_v25, -inf  ;;  %v73_v31 = vsel %vm27_vm0, %v649_v29, -inf }
   0xb   :  { %35 = vmax.xlane.f32.xlu0 %v34_v10  ;;  %59 = vmax.xlane.f32.xlu1 %v58_v11 }
   0xf   :  { %38 = vmax.xlane.f32.xlu0 %v37_v14  ;;  %62 = vmax.xlane.f32.xlu1 %v61_v15 }
  0x13   :  { %41 = vmax.xlane.f32.xlu0 %v40_v18  ;;  %65 = vmax.xlane.f32.xlu1 %v64_v19 }
  0x17   :  { %44 = vmax.xlane.f32.xlu0 %v43_v22  ;;  %68 = vmax.xlane.f32.xlu1 %v67_v23 }
  0x1b   :  { %47 = vmax.xlane.f32.xlu0 %v46_v26  ;;  %71 = vmax.xlane.f32.xlu1 %v70_v27 }
  0x1f   :  { %50 = vmax.xlane.f32.xlu0 %v49_v30  ;;  %74 = vmax.xlane.f32.xlu1 %v73_v31 }
  0x90   :  { %v30_v32 = vpop.xlane.xlu0 %29  ;;  %v33_v33 = vpop.xlane.xlu1 %32 }
  0x91   :  { %v76_v34 = vsub.f32 %v11_v0, %v30_v32  ;;  %v77_v35 = vsub.f32 %v12_v1, %v33_v33 }
  0x93   :  { %v92_v36 = vmul.f32 1.442695, %v76_v34  ;;  %v94_v37 = vmul.f32 1.442695, %v77_v35 }
  0x94   :  { %v54_v38 = vpop.xlane.xlu0 %53  ;;  %v57_v39 = vpop.xlane.xlu1 %56 }
  0x95   :  { %488 = vpow2.f32 %v92_v36  ;;  %v84_v40 = vsub.f32 %v19_v2, %v54_v38  ;;  %v85_v41 = vsub.f32 %v20_v5, %v57_v39 }
  0x96   :  { %490 = vpow2.f32 %v94_v37 }
  0x97   :  { %v108_v42 = vmul.f32 1.442695, %v84_v40  ;;  %v110_v43 = vmul.f32 1.442695, %v85_v41 }
  0x98   :  { %v36_v44 = vpop.xlane.xlu0 %35  ;;  %v60_v45 = vpop.xlane.xlu1 %59 }
  0x99   :  { %492 = vpow2.f32 %v108_v42  ;;  %v78_v46 = vsub.f32 %v13_v8, %v36_v44  ;;  %v86_v47 = vsub.f32 %v21_v9, %v60_v45  ;;  %v204_v44 = vld [vmem:[%s830_s0] sm:$0xff]  ;;  %v205_v45 = vld [vmem:[%s830_s0 + $0x8] sm:$0xff] }
  0x9a   :  { %494 = vpow2.f32 %v110_v43 }
  0x9b   :  { %v96_v48 = vmul.f32 1.442695, %v78_v46  ;;  %v112_v49 = vmul.f32 1.442695, %v86_v47  ;;  %v482_v47 = vpack.c.bf16 %v205_v45, %v204_v44 }
  0x9c   :  { %v39_v50 = vpop.xlane.xlu0 %38  ;;  %v63_v51 = vpop.xlane.xlu1 %62 }
  0x9d   :  { %496 = vpow2.f32 %v96_v48  ;;  %v79_v52 = vsub.f32 %v14_v12, %v39_v50  ;;  %v87_v53 = vsub.f32 %v22_v13, %v63_v51  ;;  %483 = vmatprep.subr.bf16.mxu0 %v482_v47  ;;  %486 = vmatprep.subr.bf16.mxu1 %v482_v47 }
  0x9e   :  { %498 = vpow2.f32 %v112_v49  ;;  %485 = vmatpush3.bf16.msra.mxu0 %v482_v47  ;;  %487 = vmatpush3.bf16.msra.mxu1 %v482_v47 }
  0x9f   :  { %v655_v54 = vpop.eup %488  ;;  %v98_v55 = vmul.f32 1.442695, %v79_v52  ;;  %v114_v56 = vmul.f32 1.442695, %v87_v53 }
  0xa0   :  { %v657_v57 = vpop.eup %490  ;;  %v42_v58 = vpop.xlane.xlu0 %41  ;;  %v124_v59 = vsel %vm27_vm0, %v655_v54, 0.0 }
  0xa1   :  { %v66_v60 = vpop.xlane.xlu1 %65  ;;  %500 = vpow2.f32 %v98_v55  ;;  %v80_v61 = vsub.f32 %v602_v16, %v42_v58  ;;  %125 = vadd.xlane.f32.xlu0 %v124_v59  ;;  %v127_v63 = vsel %vm27_vm0, %v657_v57, 0.0 }
  0xa2   :  { %v88_v62 = vsub.f32 %v607_v17, %v66_v60  ;;  %502 = vpow2.f32 %v114_v56 }
  0xa3   :  { %v665_v0 = vpop.eup %492  ;;  %v100_v1 = vmul.f32 1.442695, %v80_v61 }
  0xa4   :  { %v116_v2 = vmul.f32 1.442695, %v88_v62  ;;  %v667_v3 = vpop.eup %494  ;;  %v45_v4 = vpop.xlane.xlu0 %44  ;;  %v148_v5 = vsel %vm27_vm0, %v665_v0, 0.0 }
  0xa5   :  { %v69_v6 = vpop.xlane.xlu1 %68  ;;  %504 = vpow2.f32 %v100_v1  ;;  %v81_v7 = vsub.f32 %v616_v20, %v45_v4  ;;  %128 = vadd.xlane.f32.xlu0 %v127_v63  ;;  %149 = vadd.xlane.f32.xlu1 %v148_v5  ;;  %v151_v9 = vsel %vm27_vm0, %v667_v3, 0.0 }
  0xa6   :  { %v89_v8 = vsub.f32 %v621_v21, %v69_v6  ;;  %506 = vpow2.f32 %v116_v2 }
  0xa7   :  { %v675_v10 = vpop.eup %496  ;;  %v102_v11 = vmul.f32 1.442695, %v81_v7 }
  0xa8   :  { %v118_v12 = vmul.f32 1.442695, %v89_v8  ;;  %v677_v13 = vpop.eup %498  ;;  %v48_v14 = vpop.xlane.xlu0 %47  ;;  %v130_v15 = vsel %vm27_vm0, %v675_v10, 0.0 }
  0xa9   :  { %v72_v16 = vpop.xlane.xlu1 %71  ;;  %508 = vpow2.f32 %v102_v11  ;;  %v82_v17 = vsub.f32 %v630_v24, %v48_v14  ;;  %152 = vadd.xlane.f32.xlu1 %v151_v9  ;;  %131 = vadd.xlane.f32.xlu0 %v130_v15  ;;  %v154_v19 = vsel %vm27_vm0, %v677_v13, 0.0 }
  0xaa   :  { %v90_v18 = vsub.f32 %v635_v25, %v72_v16  ;;  %510 = vpow2.f32 %v118_v12 }
  0xab   :  { %v685_v20 = vpop.eup %500  ;;  %v104_v21 = vmul.f32 1.442695, %v82_v17 }
  0xac   :  { %v120_v22 = vmul.f32 1.442695, %v90_v18  ;;  %v687_v23 = vpop.eup %502  ;;  %v51_v26 = vpop.xlane.xlu0 %50  ;;  %v133_v27 = vsel %vm27_vm0, %v685_v20, 0.0 }
  0xad   :  { %v75_v30 = vpop.xlane.xlu1 %74  ;;  %512 = vpow2.f32 %v104_v21  ;;  %v83_v24 = vsub.f32 %v644_v28, %v51_v26  ;;  %155 = vadd.xlane.f32.xlu1 %v154_v19  ;;  %134 = vadd.xlane.f32.xlu0 %v133_v27  ;;  %v157_v31 = vsel %vm27_vm0, %v687_v23, 0.0 }
  0xae   :  { %v91_v25 = vsub.f32 %v649_v29, %v75_v30  ;;  %514 = vpow2.f32 %v120_v22 }
  0xaf   :  { %v695_v32 = vpop.eup %504  ;;  %v106_v33 = vmul.f32 1.442695, %v83_v24 }
  0xb0   :  { %v122_v34 = vmul.f32 1.442695, %v91_v25  ;;  %v697_v35 = vpop.eup %506  ;;  %v136_v36 = vsel %vm27_vm0, %v695_v32, 0.0 }
  0xb1   :  { %516 = vpow2.f32 %v106_v33  ;;  %158 = vadd.xlane.f32.xlu1 %v157_v31  ;;  %137 = vadd.xlane.f32.xlu0 %v136_v36  ;;  %v160_v28 = vsel %vm27_vm0, %v697_v35, 0.0 }
  0xb2   :  { %518 = vpow2.f32 %v122_v34 }
  0xb3   :  { %v703_v29 = vpop.eup %508 }
  0xb4   :  { %v705_v37 = vpop.eup %510  ;;  %v139_v38 = vsel %vm27_vm0, %v703_v29, 0.0 }
  0xb5   :  { %161 = vadd.xlane.f32.xlu1 %v160_v28  ;;  %140 = vadd.xlane.f32.xlu0 %v139_v38  ;;  %v163_v39 = vsel %vm27_vm0, %v705_v37, 0.0 }
  0xb7   :  { %v711_v40 = vpop.eup %512 }
  0xb8   :  { %v713_v41 = vpop.eup %514  ;;  %v142_v42 = vsel %vm27_vm0, %v711_v40, 0.0 }
  0xb9   :  { %164 = vadd.xlane.f32.xlu1 %v163_v39  ;;  %143 = vadd.xlane.f32.xlu0 %v142_v42  ;;  %v166_v43 = vsel %vm27_vm0, %v713_v41, 0.0 }
  0xbb   :  { %v725_v46 = vpop.eup %516 }
  0xbc   :  { %v727_v48 = vpop.eup %518  ;;  %v145_v49 = vsel %vm27_vm0, %v725_v46, 0.0 }
  0xbd   :  { %167 = vadd.xlane.f32.xlu1 %v166_v43  ;;  %146 = vadd.xlane.f32.xlu0 %v145_v49  ;;  %v169_v50 = vsel %vm27_vm0, %v727_v48, 0.0 }
  0xc1   :  { %170 = vadd.xlane.f32.xlu1 %v169_v50 }
 0x12e   :  { %v126_v51 = vpop.xlane.xlu0 %125 }
 0x12f   :  { %520 = vrcp.f32 %v126_v51 }
 0x132   :  { %v150_v52 = vpop.xlane.xlu1 %149  ;;  %v129_v53 = vpop.xlane.xlu0 %128 }
 0x133   :  { %522 = vrcp.f32 %v150_v52 }
 0x134   :  { %524 = vrcp.f32 %v129_v53 }
 0x136   :  { %v153_v55 = vpop.xlane.xlu1 %152  ;;  %v132_v56 = vpop.xlane.xlu0 %131 }
 0x137   :  { %526 = vrcp.f32 %v153_v55 }
 0x138   :  { %528 = vrcp.f32 %v132_v56 }
 0x139   :  { %v521_v58 = vpop.eup %520 }
 0x13a   :  { %v156_v59 = vpop.xlane.xlu1 %155  ;;  %v135_v60 = vpop.xlane.xlu0 %134  ;;  %v188_v61 = vmul.f32 %v521_v58, %v655_v54 }
 0x13b   :  { %530 = vrcp.f32 %v156_v59 }
 0x13c   :  { %532 = vrcp.f32 %v135_v60  ;;  %458 = vmatprep.mubr.msk.f32.mxu0 %vm27_vm0, %v188_v61 }
 0x13d   :  { %v523_v62 = vpop.eup %522 }
 0x13e   :  { %v525_v63 = vpop.eup %524  ;;  %v159_v1 = vpop.xlane.xlu1 %158  ;;  %v196_v4 = vmul.f32 %v523_v62, %v665_v0 }
 0x13f   :  { %v138_v2 = vpop.xlane.xlu0 %137  ;;  %534 = vrcp.f32 %v159_v1  ;;  %v189_v5 = vmul.f32 %v525_v63, %v657_v57 }
 0x140   :  { %536 = vrcp.f32 %v138_v2  ;;  %470 = vmatprep.mubr.msk.f32.mxu1 %vm27_vm0, %v196_v4 }
 0x141   :  { %v527_v6 = vpop.eup %526  ;;  %459 = vmatmul.mubr.msk.f32.vlgmr.msra.gmra.mrb[0].mxu0 %vm27_vm0, %v189_v5 }
 0x142   :  { %v529_v54 = vpop.eup %528  ;;  %v162_v7 = vpop.xlane.xlu1 %161  ;;  %v197_v9 = vmul.f32 %v527_v6, %v667_v3 }
 0x143   :  { %v141_v8 = vpop.xlane.xlu0 %140  ;;  %538 = vrcp.f32 %v162_v7  ;;  %v190_v11 = vmul.f32 %v529_v54, %v675_v10 }
 0x144   :  { %540 = vrcp.f32 %v141_v8  ;;  %471 = vmatmul.mubr.msk.f32.vlgmr.msra.gmra.mrb[0].mxu1 %vm27_vm0, %v197_v9 }
 0x145   :  { %v531_v0 = vpop.eup %530  ;;  %461 = vmatprep.mubr.msk.f32.mxu0 %vm27_vm0, %v190_v11 }
 0x146   :  { %v533_v57 = vpop.eup %532  ;;  %v165_v12 = vpop.xlane.xlu1 %164  ;;  %v198_v15 = vmul.f32 %v531_v0, %v677_v13 }
 0x147   :  { %v144_v14 = vpop.xlane.xlu0 %143  ;;  %542 = vrcp.f32 %v165_v12  ;;  %v191_v16 = vmul.f32 %v533_v57, %v685_v20 }
 0x148   :  { %544 = vrcp.f32 %v144_v14  ;;  %473 = vmatprep.mubr.msk.f32.mxu1 %vm27_vm0, %v198_v15 }
 0x149   :  { %v535_v3 = vpop.eup %534  ;;  %462 = vmatmul.mubr.msk.f32.gmra.mrb[2].mxu0 %vm27_vm0, %v191_v16 }
 0x14a   :  { %v537_v10 = vpop.eup %536  ;;  %v168_v17 = vpop.xlane.xlu1 %167  ;;  %v199_v19 = vmul.f32 %v535_v3, %v687_v23 }
 0x14b   :  { %v147_v18 = vpop.xlane.xlu0 %146  ;;  %546 = vrcp.f32 %v168_v17  ;;  %v192_v21 = vmul.f32 %v537_v10, %v695_v32 }
 0x14c   :  { %548 = vrcp.f32 %v147_v18  ;;  %474 = vmatmul.mubr.msk.f32.gmra.mrb[2].mxu1 %vm27_vm0, %v199_v19 }
 0x14d   :  { %v539_v13 = vpop.eup %538  ;;  %464 = vmatprep.mubr.msk.f32.mxu0 %vm27_vm0, %v192_v21 }
 0x14e   :  { %v541_v20 = vpop.eup %540  ;;  %v171_v22 = vpop.xlane.xlu1 %170  ;;  %v200_v26 = vmul.f32 %v539_v13, %v697_v35 }
 0x14f   :  { %550 = vrcp.f32 %v171_v22  ;;  %v193_v27 = vmul.f32 %v541_v20, %v703_v29 }
 0x150   :  { %476 = vmatprep.mubr.msk.f32.mxu1 %vm27_vm0, %v200_v26 }
 0x151   :  { %v543_v30 = vpop.eup %542  ;;  %465 = vmatmul.mubr.msk.f32.gmra.mrb[4].mxu0 %vm27_vm0, %v193_v27 }
 0x152   :  { %v545_v23 = vpop.eup %544  ;;  %v201_v24 = vmul.f32 %v543_v30, %v705_v37 }
 0x153   :  { %v194_v25 = vmul.f32 %v545_v23, %v711_v40 }
 0x154   :  { %477 = vmatmul.mubr.msk.f32.gmra.mrb[4].mxu1 %vm27_vm0, %v201_v24 }
 0x155   :  { %v547_v31 = vpop.eup %546  ;;  %467 = vmatprep.mubr.msk.f32.mxu0 %vm27_vm0, %v194_v25 }
 0x156   :  { %v549_v32 = vpop.eup %548  ;;  %v202_v33 = vmul.f32 %v547_v31, %v713_v41 }
 0x157   :  { %v195_v34 = vmul.f32 %v549_v32, %v725_v46 }
 0x158   :  { %479 = vmatprep.mubr.msk.f32.mxu1 %vm27_vm0, %v202_v33 }
 0x159   :  { %v551_v35 = vpop.eup %550  ;;  %468 = vmatmul.mubr.msk.f32.gmra.mrb[6].mxu0 %vm27_vm0, %v195_v34 }
 0x15a   :  { %v203_v36 = vmul.f32 %v551_v35, %v727_v48 }
 0x15c   :  { %480 = vmatmul.mubr.msk.f32.gmra.mrb[6].mxu1 %vm27_vm0, %v203_v36 }
 0x214   :  { %v460_v28 = vpop.f32.mrb[0].mxu0 }
 0x215   :  { %401 = vst.msk [vmem:[%s831_s2 + $0x8] sm:$0xff] %vm399_vm1, %v460_v28  ;;  %v320_v29 = vpop.f32.mrb[1].mxu0 }
 0x216   :  { %400 = vst.msk [vmem:[%s831_s2] sm:$0xff] %vm399_vm1, %v320_v29 }
 0x217   :  { %v472_v37 = vpop.f32.mrb[0].mxu1 }
 0x218   :  { %409 = vst.msk [vmem:[%s831_s2 + $0x48] sm:$0xff] %vm399_vm1, %v472_v37  ;;  %v360_v38 = vpop.f32.mrb[1].mxu1 }
 0x219   :  { %408 = vst.msk [vmem:[%s831_s2 + $0x40] sm:$0xff] %vm399_vm1, %v360_v38 }
 0x21c   :  { %v463_v39 = vpop.f32.mrb[2].mxu0 }
 0x21d   :  { %403 = vst.msk [vmem:[%s831_s2 + $0x18] sm:$0xff] %vm399_vm1, %v463_v39  ;;  %v330_v40 = vpop.f32.mrb[3].mxu0 }
 0x21e   :  { %402 = vst.msk [vmem:[%s831_s2 + $0x10] sm:$0xff] %vm399_vm1, %v330_v40 }
 0x21f   :  { %v475_v41 = vpop.f32.mrb[2].mxu1 }
 0x220   :  { %411 = vst.msk [vmem:[%s831_s2 + $0x58] sm:$0xff] %vm399_vm1, %v475_v41  ;;  %v370_v42 = vpop.f32.mrb[3].mxu1 }
 0x221   :  { %410 = vst.msk [vmem:[%s831_s2 + $0x50] sm:$0xff] %vm399_vm1, %v370_v42 }
 0x224   :  { %v466_v43 = vpop.f32.mrb[4].mxu0 }
 0x225   :  { %405 = vst.msk [vmem:[%s831_s2 + $0x28] sm:$0xff] %vm399_vm1, %v466_v43  ;;  %v340_v44 = vpop.f32.mrb[5].mxu0 }
 0x226   :  { %404 = vst.msk [vmem:[%s831_s2 + $0x20] sm:$0xff] %vm399_vm1, %v340_v44 }
 0x227   :  { %v478_v45 = vpop.f32.mrb[4].mxu1 }
 0x228   :  { %413 = vst.msk [vmem:[%s831_s2 + $0x68] sm:$0xff] %vm399_vm1, %v478_v45  ;;  %v380_v46 = vpop.f32.mrb[5].mxu1 }
 0x229   :  { %412 = vst.msk [vmem:[%s831_s2 + $0x60] sm:$0xff] %vm399_vm1, %v380_v46 }
 0x22c   :  { %v469_v47 = vpop.f32.mrb[6].mxu0 }
 0x22d   :  { %407 = vst.msk [vmem:[%s831_s2 + $0x38] sm:$0xff] %vm399_vm1, %v469_v47  ;;  %v350_v48 = vpop.f32.mrb[7].mxu0 }
 0x22e   :  { %406 = vst.msk [vmem:[%s831_s2 + $0x30] sm:$0xff] %vm399_vm1, %v350_v48 }
 0x22f   :  { %v481_v49 = vpop.f32.mrb[6].mxu1 }
 0x230   :  { %415 = vst.msk [vmem:[%s831_s2 + $0x78] sm:$0xff] %vm399_vm1, %v481_v49  ;;  %v390_v50 = vpop.f32.mrb[7].mxu1 }
 0x231   :  { %414 = vst.msk [vmem:[%s831_s2 + $0x70] sm:$0xff] %vm399_vm1, %v390_v50 }

</bundles_post_ra>
